<compile_context>
chip_gen: v6e
topology: v6e:2x2x1
jax: 0.10.0
libtpu: 0.0.40
codegen_flags: <defaults>
</compile_context>

<pallas_src>
import jax
import jax.numpy as jnp
from jax.experimental import pallas as pl
from jax.experimental.pallas import tpu as pltpu


def _round_up(x: int, m: int) -> int:
    return ((x + m - 1) // m) * m


def _itm_head_kernel(x_ref, w_ref, b_ref, o_ref):
    # x_ref: [TB, H], w_ref: [H, out_dim], b_ref: [1, out_dim] (f32),
    # o_ref: [TB, out_dim]
    acc = jnp.dot(x_ref[...], w_ref[...], preferred_element_type=jnp.float32)
    acc = acc + b_ref[...]                    # bias stays in f32, added to f32 acc
    o_ref[...] = acc.astype(o_ref.dtype)


def mm_itm_head(x_pooled, weight_t, bias, *, tb: int = 2048):
    """ITM head: x_pooled @ weight_t + bias.

    x_pooled: [B, H], weight_t: [H, out_dim], bias: [out_dim] or [1, out_dim]
    returns:  [B, out_dim] in x_pooled.dtype
    """
    B, H = x_pooled.shape
    out_dim = weight_t.shape[1]

    # Sublane packing for the batch axis: 8 rows for 4-byte dtypes, 16 for bf16.
    x_bytes = jnp.dtype(x_pooled.dtype).itemsize
    sub = 16 if x_bytes == 2 else 8

    # Batch tile selection:
    #  * sanitize the user tile to a multiple of the sublane packing,
    #  * cap it so the two pipelined x buffers fit a ~24 MiB VMEM budget,
    #  * never exceed the (sublane-rounded) batch.
    tb = _round_up(max(tb, sub), sub)
    vmem_budget_x = 24 * 1024 * 1024
    tb_cap = max(sub, (vmem_budget_x // (2 * H * x_bytes)) // sub * sub)
    TB = min(tb, tb_cap, _round_up(B, sub))

    # Megacore (v7x): a 1-step grid leaves one TensorCore idle. For non-tiny
    # batches split so there are at least 2 grid steps.
    if B > 2 * sub and pl.cdiv(B, TB) < 2:
        TB = _round_up(pl.cdiv(B, 2), sub)

    grid = (pl.cdiv(B, TB),)

    bias_f32 = bias.reshape(1, out_dim).astype(jnp.float32)

    out = pl.pallas_call(
        _itm_head_kernel,
        out_shape=jax.ShapeDtypeStruct((B, out_dim), x_pooled.dtype),
        grid_spec=pltpu.PrefetchScalarGridSpec(
            num_scalar_prefetch=0,
            grid=grid,
            in_specs=[
                # x: streamed per batch tile (double-buffered by Pallas).
                pl.BlockSpec((TB, H), lambda i: (i, 0)),
                # weight / bias: constant block index -> resident in VMEM.
                pl.BlockSpec((H, out_dim), lambda i: (0, 0)),
                pl.BlockSpec((1, out_dim), lambda i: (0, 0)),
            ],
            out_specs=pl.BlockSpec((TB, out_dim), lambda i: (i, 0)),
        ),
        compiler_params=pltpu.CompilerParams(
            dimension_semantics=("parallel",),
            vmem_limit_bytes=32 * 1024 * 1024,
        ),
    )(x_pooled, weight_t, bias_f32)

    return out


if __name__ == "__main__":
    # Small shapes consistent with the module: batch=2, HSIZE=32, out_dim=2.
    B, HSIZE = 2, 32

    key = jax.random.PRNGKey(0)
    k_x, k_w, k_b, k_x2 = jax.random.split(key, 4)

    # nn.Linear(HSIZE, 2): W is [2, H], b is [2].
    w = jax.random.normal(k_w, (2, HSIZE), dtype=jnp.float32) * 0.02
    b = jax.random.normal(k_b, (2,), dtype=jnp.float32) * 0.02
    x_pooled = jax.random.normal(k_x, (B, HSIZE), dtype=jnp.float32)

    w_t = w.T  # [H, 2]

    # 1) Tiny batch: single partial grid tile (B=2 inside an 8-row block).
    out = jax.block_until_ready(mm_itm_head(x_pooled, w_t, b))
    ref = x_pooled @ w_t + b.reshape(1, 2)
    assert out.shape == (B, 2)
    assert jnp.allclose(out, ref, atol=1e-5, rtol=1e-5)

    # 2) Multi-step + ragged batch: B=20 with tb=8 -> 3 grid steps, masked tail.
    B2 = 20
    x2 = jax.random.normal(k_x2, (B2, HSIZE), dtype=jnp.float32)
    out2 = jax.block_until_ready(mm_itm_head(x2, w_t, b, tb=8))
    ref2 = x2 @ w_t + b.reshape(1, 2)
    assert out2.shape == (B2, 2)
    assert jnp.allclose(out2, ref2, atol=1e-5, rtol=1e-5)

    # 3) bf16 activation/weight stream (16-row sublane tiles), f32 bias + acc.
    x3 = x2.astype(jnp.bfloat16)
    w3 = w_t.astype(jnp.bfloat16)
    out3 = jax.block_until_ready(mm_itm_head(x3, w3, b, tb=8))
    ref3 = x3.astype(jnp.float32) @ w3.astype(jnp.float32) + b.reshape(1, 2)
    assert out3.shape == (B2, 2)
    assert out3.dtype == jnp.bfloat16
    assert jnp.allclose(out3.astype(jnp.float32), ref3, atol=2e-2, rtol=2e-2)

    print("KERNEL_OK")
</pallas_src>

<mosaic_0001>
module attributes {stable_mosaic.version = 11 : i64} {
  func.func @_itm_head_kernel(%arg0: i32, %arg1: memref<8x32xf32, #tpu.memory_space<vmem>>, %arg2: memref<32x2xf32, #tpu.memory_space<vmem>>, %arg3: memref<1x2xf32, #tpu.memory_space<vmem>>, %arg4: memref<8x2xf32, #tpu.memory_space<vmem>>) attributes {dimension_semantics = [#tpu.dimension_semantics<parallel>], iteration_bounds = array<i64: 1>, scalar_prefetch = 0 : i64, scratch_operands = 0 : i64, tpu.core_type = #tpu.core_type<tc>, window_params = [{transform_indices = @transform_0, window_bounds = array<i64: 8, 32>}, {pipeline_mode = #tpu.pipeline_mode<synchronous>, transform_indices = @transform_1, window_bounds = array<i64: 32, 2>}, {pipeline_mode = #tpu.pipeline_mode<synchronous>, transform_indices = @transform_2, window_bounds = array<i64: 1, 2>}, {transform_indices = @transform_3, window_bounds = array<i64: 8, 2>}]} {
    %c0 = arith.constant 0 : index
    %c0_0 = arith.constant 0 : index
    %0 = vector.load %arg1[%c0, %c0_0] : memref<8x32xf32, #tpu.memory_space<vmem>>, vector<8x32xf32>
    %c0_1 = arith.constant 0 : index
    %c0_2 = arith.constant 0 : index
    %1 = vector.load %arg2[%c0_1, %c0_2] : memref<32x2xf32, #tpu.memory_space<vmem>>, vector<32x2xf32>
    %cst = arith.constant dense<0.000000e+00> : vector<8x2xf32>
    %2 = tpu.matmul %0, %1, %cst {dimension_numbers = #tpu.dot_dimension_numbers<[1], [0], [0], [1], [0, 0, 1, 1], [], []>} : vector<8x32xf32>, vector<32x2xf32>, vector<8x2xf32> -> vector<8x2xf32>
    %c0_3 = arith.constant 0 : index
    %c0_4 = arith.constant 0 : index
    %3 = vector.load %arg3[%c0_3, %c0_4] : memref<1x2xf32, #tpu.memory_space<vmem>>, vector<1x2xf32>
    %4 = vector.broadcast %3 : vector<1x2xf32> to vector<8x2xf32>
    %5 = arith.addf %2, %4 : vector<8x2xf32>
    %c0_5 = arith.constant 0 : index
    %c0_6 = arith.constant 0 : index
    %6 = vector.load %arg4[%c0_5, %c0_6] : memref<8x2xf32, #tpu.memory_space<vmem>>, vector<8x2xf32>
    tpu.vector_store %arg4[%c0_5, %c0_6], %5 {strides = array<i32>} : memref<8x2xf32, #tpu.memory_space<vmem>>, vector<8x2xf32>,
    return
  }
  func.func @transform_0(%arg0: i32) -> (i32, i32) {
    %c0_i32 = arith.constant 0 : i32
    %c0_i32_0 = arith.constant 0 : i32
    return %arg0, %c0_i32 : i32, i32
  }
  func.func @transform_1(%arg0: i32) -> (i32, i32) {
    %c0_i32 = arith.constant 0 : i32
    %c0_i32_0 = arith.constant 0 : i32
    %c0_i32_1 = arith.constant 0 : i32
    return %c0_i32, %c0_i32_0 : i32, i32
  }
  func.func @transform_2(%arg0: i32) -> (i32, i32) {
    %c0_i32 = arith.constant 0 : i32
    %c0_i32_0 = arith.constant 0 : i32
    %c0_i32_1 = arith.constant 0 : i32
    return %c0_i32, %c0_i32_0 : i32, i32
  }
  func.func @transform_3(%arg0: i32) -> (i32, i32) {
    %c0_i32 = arith.constant 0 : i32
    %c0_i32_0 = arith.constant 0 : i32
    return %arg0, %c0_i32 : i32, i32
  }
}

</mosaic_0001>

<bundles_post_ra>
// kernel: tpu_custom_call.1
= control target key start
LH: loop header
LB: loop body
LE: loop exit
PB: predicated region body
PF: predicated region fallthrough
CT: control target
= control target key end

     0   :  { %8 = vsyncpa [#allocation3], 0  ;;  %v164_v1 = vmov 0.0   ;;  %vm165_vm0 = vmmov 0   ;;  %vm27_vm1 = vcmask 261120   ;;  %vm101_vm2 = vcmask 15360   ;;  %s210_s0 = inlined_call_operand.vmem [shape: f32[2,32], index: 0, kind: input, shape index: {}]   ;;  %s211_s1 = inlined_call_operand.vmem [shape: f32[32,2], index: 1, kind: input, shape index: {}]   ;;  %s212_s2 = inlined_call_operand.vmem [shape: f32[1,2], index: 2, kind: input, shape index: {}]   ;;  %s213_s3 = inlined_call_operand.hbm [shape: f32[2,2], index: 3, kind: output, shape index: {}]  }
   0x1   :  { %v19_v0 = vld [vmem:[%s211_s1 + $0x18] sm:$0xff]  ;;  %126 = vmatprep.subr.mxu0 %v164_v1  ;;  %v18_v2 = vld [vmem:[%s211_s1 + $0x10] sm:$0xff]  ;;  %134 = vmatprep.mubr.msk.f32.mxu0 %vm165_vm0, %v164_v1  ;;  %v17_v3 = vld [vmem:[%s211_s1 + $0x8] sm:$0xff] }
   0x2   :  { %127 = vmatpush3.msra.mxu0 %v19_v0  ;;  %v16_v4 = vld [vmem:[%s211_s1] sm:$0xff] }
   0x3   :  { %128 = vmatprep.subr.mxu0 %v164_v1  ;;  %v15_v5 = vld [vmem:[%s210_s0] sm:$0xff] }
   0x4   :  { %129 = vmatpush3.msra.mxu0 %v18_v2  ;;  %v119_v6 = vld [vmem:[%s212_s2] ss:$0 sm:$0xff] }
   0x5   :  { %130 = vmatprep.subr.mxu0 %v164_v1 }
   0x6   :  { %131 = vmatpush3.msra.mxu0 %v17_v3 }
   0x7   :  { %132 = vmatprep.subr.mxu0 %v164_v1 }
   0x8   :  { %133 = vmatpush3.msra.mxu0 %v16_v4 }
   0x9   :  { %135 = vmatmul.mubr.msk.f32.vlgmr.msra.gmra.mxu0 %vm27_vm1, %v15_v5 }
  0xc9   :  { %v97_v7 = vpop.f32.mrf.mxu0 }
  0xca   :  { %v98_v8 = vadd.f32 %v119_v6, %v97_v7 }
  0xcb   :  { %v136_v9 = vpop.f32.mrf.mxu0 }
  0xcc   :  { %102 = vst.msk [vmem:[#allocation2] sm:$0xff] %vm101_vm2, %v98_v8 }
  0xcd   :  { %107 = vsyncadd [#allocation3], 96  ;;  %s166_s1 = smov [#allocation2]  }
  0xce   :  { %s108_s24 = sshll.u32 %s166_s1, 4  ;;  %s109_s24 = int_to_ptr.vmem [resolvable:$true] %s108_s24 }
  0xcf   :  { %s142_s25 = scalar_lea.vmem %s109_s24, 32  ;;  %s146_s0 = scalar_lea.vmem %s109_s24, 128 }
  0xd0   :  { %p143_p0 = scmp.ne.s32.totalorder %s109_s24, %s142_s25  ;;  %p147_p1 = scmp.lt.s32.totalorder %s109_s24, %s109_s24 }
  0xd1   :  { %p148_p2 = scmp.lt.s32.totalorder %s146_s0, %s142_s25 }
  0xd3   :  { %p149_p3 = por %p148_p2, %p147_p1 }
  0xd5   :  { %p150_p4 = pnand %p149_p3, %p143_p0 }
  0xd7   :  { %153 = shalt.err (!%p150_p4)
}
  0xd8   :  { %s167_s26 = smov 32   ;;  %s168_s27 = smov 2  }
  0xd9   :  { %114 = dma.vmem_to_hbm [thread:$0]  %s109_s24, 32, %s213_s3, [#allocation3], %s167_s26, %s167_s26, %s168_s27  }
  0xda   :  { %162 = dma.done.wait [#allocation3], 128  }
  0xdb   :  { %163 = vsyncadd [#allocation3], 4294967168 }
  0xdc   :  { %118 = vsyncpa [#allocation3], 1 }

</bundles_post_ra>
